<compile_context>
chip_gen: v5e
topology: v5e:2x2
jax: 0.10.0
libtpu: 0.0.40
codegen_flags: <defaults>
</compile_context>

<pallas_src>
import jax
import jax.numpy as jnp
from jax.experimental import pallas as pl
from jax.experimental.pallas import tpu as pltpu

# Budget for in-flight input DMA (2 inputs x 2 pipeline buffers) used to pick
# the per-step batch tile Bt.
_VMEM_IN_FLIGHT_BUDGET = 24 * 1024 * 1024


def _spa_kernel(org_ref, enh_ref, ph_ref, pwc_ref, shm_ref, out_ref):
    """One grid step: Bt batch elements stacked along rows.

    org_ref, enh_ref : (Bt*C*H, W)   raw images, flattened over (batch, chan, row)
    ph_ref           : (R, Bt*C*H)   fused channel-mean + 4-row pool (R = Bt*Hp,
                                     entries 1/(4C), block-diagonal per batch)
    pwc_ref          : (3, W, Wp)    column pool / left-neighbor / right-neighbor
    shm_ref          : (2, R, R)     up / down shift matrices (zero-padded,
                                     block-diagonal per batch tile)
    out_ref          : (1, R, Wp)    sum over directions of squared differences
    """
    # Linearity: pool/shift the org-enh difference once.
    diff = org_ref[...] - enh_ref[...]                                      # (Bt*C*H, W)

    # Fused channel mean + 4-row average pool: one MXU pass over the data.
    rowp = jnp.dot(ph_ref[...], diff, preferred_element_type=jnp.float32)   # (R, W)

    # Column pool and its zero-padded +/-1 column neighbors (shared LHS).
    x    = jnp.dot(rowp, pwc_ref[0], preferred_element_type=jnp.float32)    # (R, Wp)
    nb_l = jnp.dot(rowp, pwc_ref[1], preferred_element_type=jnp.float32)    # x[:, j-1]
    nb_r = jnp.dot(rowp, pwc_ref[2], preferred_element_type=jnp.float32)    # x[:, j+1]

    # Zero-padded +/-1 row neighbors; block-diagonal matrices never mix rows
    # from different batch elements inside the stacked map.
    nb_u = jnp.dot(shm_ref[0], x, preferred_element_type=jnp.float32)       # x[i-1, :]
    nb_d = jnp.dot(shm_ref[1], x, preferred_element_type=jnp.float32)       # x[i+1, :]

    res = ((x - nb_l) ** 2 + (x - nb_r) ** 2 +
           (x - nb_u) ** 2 + (x - nb_d) ** 2)                               # (R, Wp)
    out_ref[0] = res.astype(out_ref.dtype)


def _pick_batch_tile(B, C, H, W):
    """Largest batch-per-step that divides B, keeps the input block's
    second-minor dim 8-aligned, and fits the in-flight DMA budget."""
    per_batch_in_flight = 2 * 2 * C * H * W * 4      # 2 inputs x 2 buffers x f32
    cap = max(1, min(B, _VMEM_IN_FLIGHT_BUDGET // max(per_batch_in_flight, 1)))
    for cand in range(cap, 0, -1):
        if B % cand == 0 and (cand * C * H) % 8 == 0:
            return cand
    # Fallback: one full-array block (block dims == array dims, so the (8,128)
    # divisibility rule does not apply).
    return B


@jax.jit
def spatial_consistency_loss(org, enhance):
    """Pallas implementation of SpatialConsistancyLoss.forward."""
    B, C, H, W = org.shape
    if H % 4 != 0 or W % 4 != 0:
        raise ValueError("AvgPool2d(4) path requires H and W divisible by 4")
    Hp, Wp = H // 4, W // 4

    bt = _pick_batch_tile(B, C, H, W)
    R = bt * Hp
    n_steps = B // bt
    blk_rows = bt * C * H

    f32 = jnp.float32
    org2 = org.reshape(B * C * H, W).astype(f32)
    enh2 = enhance.reshape(B * C * H, W).astype(f32)

    # Fused channel-mean + row-pool matrix: stacked row r belongs to batch
    # r // (C*H) and image row r % H; it contributes 1/(4C) to pooled row
    # (r // (C*H)) * Hp + (r % H) // 4.
    rin = jnp.arange(blk_rows)
    tgt = (rin // (C * H)) * Hp + (rin % H) // 4
    ph = (jnp.arange(R)[:, None] == tgt[None, :]).astype(f32) * (1.0 / (4.0 * C))

    # Column pool and its shifted variants (left/right neighbors with zero pad
    # come out automatically since the shifted bucket falls off the matrix).
    wb = jnp.arange(W)[:, None] // 4
    jc = jnp.arange(Wp)[None, :]
    pw   = (wb == jc).astype(f32) * 0.25
    pw_l = (wb == jc - 1).astype(f32) * 0.25    # (rowp @ pw_l)[:, j] = x[:, j-1]
    pw_r = (wb == jc + 1).astype(f32) * 0.25    # (rowp @ pw_r)[:, j] = x[:, j+1]
    pwc = jnp.stack([pw, pw_l, pw_r], axis=0)   # (3, W, Wp)

    # Up/down shift matrices on the stacked pooled map, zeroed at each batch
    # tile's boundary rows (the conv's zero padding).
    ro = jnp.arange(R)[:, None]
    ri = jnp.arange(R)[None, :]
    su = ((ri == ro - 1) & (ro % Hp != 0)).astype(f32)          # (su @ x)[i] = x[i-1]
    sd = ((ri == ro + 1) & (ro % Hp != Hp - 1)).astype(f32)     # (sd @ x)[i] = x[i+1]
    shm = jnp.stack([su, sd], axis=0)                            # (2, R, R)

    # VMEM estimate (inputs double-buffered + resident constants + temps).
    blk_bytes = blk_rows * W * 4
    const_bytes = (R * blk_rows + 3 * W * Wp + 2 * R * R + R * Wp) * 4
    est_vmem = 5 * blk_bytes + 2 * const_bytes + (R * W + 8 * R * Wp) * 4
    vmem_limit = int(est_vmem * 1.25) if est_vmem > 30 * 1024 * 1024 else None
    # TODO(synk): for very large single images (block > ~48 MiB in flight) add
    # an H-tiled grid (B, H//tH) instead of raising vmem_limit_bytes; this
    # matters most on v7x's 64 MiB VMEM.

    flops_per_step = (2 * R * blk_rows * W + 3 * 2 * R * W * Wp +
                      2 * 2 * R * R * Wp + 12 * R * Wp)
    bytes_accessed = (2 * B * C * H * W + B * Hp * Wp) * 4 + const_bytes

    out = pl.pallas_call(
        _spa_kernel,
        out_shape=jax.ShapeDtypeStruct((n_steps, R, Wp), f32),
        grid=(n_steps,),
        in_specs=[
            pl.BlockSpec((blk_rows, W), lambda b: (b, 0)),
            pl.BlockSpec((blk_rows, W), lambda b: (b, 0)),
            pl.BlockSpec((R, blk_rows), lambda b: (0, 0)),
            pl.BlockSpec((3, W, Wp), lambda b: (0, 0, 0)),
            pl.BlockSpec((2, R, R), lambda b: (0, 0, 0)),
        ],
        out_specs=pl.BlockSpec((1, R, Wp), lambda b: (b, 0, 0)),
        compiler_params=pltpu.CompilerParams(
            dimension_semantics=("parallel",),
            vmem_limit_bytes=vmem_limit),
        cost_estimate=pl.CostEstimate(
            flops=n_steps * flops_per_step,
            transcendentals=0,
            bytes_accessed=bytes_accessed),
    )(org2, enh2, ph, pwc, shm)

    # (n_steps, bt*Hp, Wp) is row-major identical to (B, Hp, Wp).
    return out.reshape(B, 1, Hp, Wp)


def _reference(org, enhance):
    """Pure-JAX reference mirroring the PyTorch module."""
    om = jnp.mean(org, axis=1, keepdims=True)
    em = jnp.mean(enhance, axis=1, keepdims=True)

    def pool(x):
        b, _, h, w = x.shape
        return x.reshape(b, 1, h // 4, 4, w // 4, 4).mean(axis=(3, 5))

    op, ep = pool(om), pool(em)

    def dirs(x):
        xp = jnp.pad(x, ((0, 0), (0, 0), (1, 1), (1, 1)))
        c = xp[:, :, 1:-1, 1:-1]
        return (c - xp[:, :, 1:-1, :-2], c - xp[:, :, 1:-1, 2:],
                c - xp[:, :, :-2, 1:-1], c - xp[:, :, 2:, 1:-1])

    ol, orr, ou, od = dirs(op)
    el, er, eu, ed = dirs(ep)
    return (ol - el) ** 2 + (orr - er) ** 2 + (ou - eu) ** 2 + (od - ed) ** 2


if __name__ == "__main__":
    key = jax.random.PRNGKey(0)
    k1, k2 = jax.random.split(key)
    B, C, H, W = 2, 4, 16, 16
    org = jax.random.uniform(k1, (B, C, H, W), dtype=jnp.float32)
    enhance = jax.random.uniform(k2, (B, C, H, W), dtype=jnp.float32)

    out = spatial_consistency_loss(org, enhance)
    out = jax.block_until_ready(out)

    ref = _reference(org, enhance)
    assert out.shape == (B, 1, H // 4, W // 4)
    assert jnp.allclose(out, ref, rtol=1e-4, atol=1e-5), (
        f"max abs err {jnp.max(jnp.abs(out - ref))}")

    print("KERNEL_OK")
</pallas_src>

<mosaic_0001>
module attributes {stable_mosaic.version = 11 : i64} {
  func.func @_spa_kernel(%arg0: i32, %arg1: memref<128x16xf32, #tpu.memory_space<vmem>>, %arg2: memref<128x16xf32, #tpu.memory_space<vmem>>, %arg3: memref<8x128xf32, #tpu.memory_space<vmem>>, %arg4: memref<3x16x4xf32, #tpu.memory_space<vmem>>, %arg5: memref<2x8x8xf32, #tpu.memory_space<vmem>>, %arg6: memref<1x8x4xf32, #tpu.memory_space<vmem>>) attributes {dimension_semantics = [#tpu.dimension_semantics<parallel>], iteration_bounds = array<i64: 1>, scalar_prefetch = 0 : i64, scratch_operands = 0 : i64, tpu.core_type = #tpu.core_type<tc>, window_params = [{transform_indices = @transform_0, window_bounds = array<i64: 128, 16>}, {transform_indices = @transform_1, window_bounds = array<i64: 128, 16>}, {pipeline_mode = #tpu.pipeline_mode<synchronous>, transform_indices = @transform_2, window_bounds = array<i64: 8, 128>}, {pipeline_mode = #tpu.pipeline_mode<synchronous>, transform_indices = @transform_3, window_bounds = array<i64: 3, 16, 4>}, {pipeline_mode = #tpu.pipeline_mode<synchronous>, transform_indices = @transform_4, window_bounds = array<i64: 2, 8, 8>}, {transform_indices = @transform_5, window_bounds = array<i64: 1, 8, 4>}]} {
    %c0 = arith.constant 0 : index
    %c0_0 = arith.constant 0 : index
    %0 = vector.load %arg1[%c0, %c0_0] : memref<128x16xf32, #tpu.memory_space<vmem>>, vector<128x16xf32>
    %c0_1 = arith.constant 0 : index
    %c0_2 = arith.constant 0 : index
    %1 = vector.load %arg2[%c0_1, %c0_2] : memref<128x16xf32, #tpu.memory_space<vmem>>, vector<128x16xf32>
    %2 = arith.subf %0, %1 : vector<128x16xf32>
    %c0_3 = arith.constant 0 : index
    %c0_4 = arith.constant 0 : index
    %3 = vector.load %arg3[%c0_3, %c0_4] : memref<8x128xf32, #tpu.memory_space<vmem>>, vector<8x128xf32>
    %cst = arith.constant dense<0.000000e+00> : vector<8x16xf32>
    %4 = tpu.matmul %3, %2, %cst {dimension_numbers = #tpu.dot_dimension_numbers<[1], [0], [0], [1], [0, 0, 1, 1], [], []>} : vector<8x128xf32>, vector<128x16xf32>, vector<8x16xf32> -> vector<8x16xf32>
    %c0_5 = arith.constant 0 : index
    %c0_6 = arith.constant 0 : index
    %c0_7 = arith.constant 0 : index
    %5 = vector.load %arg4[%c0_5, %c0_6, %c0_7] : memref<3x16x4xf32, #tpu.memory_space<vmem>>, vector<1x16x4xf32>
    %6 = vector.shape_cast %5 : vector<1x16x4xf32> to vector<16x4xf32>
    %cst_8 = arith.constant dense<0.000000e+00> : vector<8x4xf32>
    %7 = tpu.matmul %4, %6, %cst_8 {dimension_numbers = #tpu.dot_dimension_numbers<[1], [0], [0], [1], [0, 0, 1, 1], [], []>} : vector<8x16xf32>, vector<16x4xf32>, vector<8x4xf32> -> vector<8x4xf32>
    %c1 = arith.constant 1 : index
    %c0_9 = arith.constant 0 : index
    %c0_10 = arith.constant 0 : index
    %8 = vector.load %arg4[%c1, %c0_9, %c0_10] : memref<3x16x4xf32, #tpu.memory_space<vmem>>, vector<1x16x4xf32>
    %9 = vector.shape_cast %8 : vector<1x16x4xf32> to vector<16x4xf32>
    %cst_11 = arith.constant dense<0.000000e+00> : vector<8x4xf32>
    %10 = tpu.matmul %4, %9, %cst_11 {dimension_numbers = #tpu.dot_dimension_numbers<[1], [0], [0], [1], [0, 0, 1, 1], [], []>} : vector<8x16xf32>, vector<16x4xf32>, vector<8x4xf32> -> vector<8x4xf32>
    %c2 = arith.constant 2 : index
    %c0_12 = arith.constant 0 : index
    %c0_13 = arith.constant 0 : index
    %11 = vector.load %arg4[%c2, %c0_12, %c0_13] : memref<3x16x4xf32, #tpu.memory_space<vmem>>, vector<1x16x4xf32>
    %12 = vector.shape_cast %11 : vector<1x16x4xf32> to vector<16x4xf32>
    %cst_14 = arith.constant dense<0.000000e+00> : vector<8x4xf32>
    %13 = tpu.matmul %4, %12, %cst_14 {dimension_numbers = #tpu.dot_dimension_numbers<[1], [0], [0], [1], [0, 0, 1, 1], [], []>} : vector<8x16xf32>, vector<16x4xf32>, vector<8x4xf32> -> vector<8x4xf32>
    %c0_15 = arith.constant 0 : index
    %c0_16 = arith.constant 0 : index
    %c0_17 = arith.constant 0 : index
    %14 = vector.load %arg5[%c0_15, %c0_16, %c0_17] : memref<2x8x8xf32, #tpu.memory_space<vmem>>, vector<1x8x8xf32>
    %15 = vector.shape_cast %14 : vector<1x8x8xf32> to vector<8x8xf32>
    %cst_18 = arith.constant dense<0.000000e+00> : vector<8x4xf32>
    %16 = tpu.matmul %15, %7, %cst_18 {dimension_numbers = #tpu.dot_dimension_numbers<[1], [0], [0], [1], [0, 0, 1, 1], [], []>} : vector<8x8xf32>, vector<8x4xf32>, vector<8x4xf32> -> vector<8x4xf32>
    %c1_19 = arith.constant 1 : index
    %c0_20 = arith.constant 0 : index
    %c0_21 = arith.constant 0 : index
    %17 = vector.load %arg5[%c1_19, %c0_20, %c0_21] : memref<2x8x8xf32, #tpu.memory_space<vmem>>, vector<1x8x8xf32>
    %18 = vector.shape_cast %17 : vector<1x8x8xf32> to vector<8x8xf32>
    %cst_22 = arith.constant dense<0.000000e+00> : vector<8x4xf32>
    %19 = tpu.matmul %18, %7, %cst_22 {dimension_numbers = #tpu.dot_dimension_numbers<[1], [0], [0], [1], [0, 0, 1, 1], [], []>} : vector<8x8xf32>, vector<8x4xf32>, vector<8x4xf32> -> vector<8x4xf32>
    %20 = arith.subf %7, %10 : vector<8x4xf32>
    %21 = arith.mulf %20, %20 : vector<8x4xf32>
    %22 = arith.subf %7, %13 : vector<8x4xf32>
    %23 = arith.mulf %22, %22 : vector<8x4xf32>
    %24 = arith.addf %21, %23 : vector<8x4xf32>
    %25 = arith.subf %7, %16 : vector<8x4xf32>
    %26 = arith.mulf %25, %25 : vector<8x4xf32>
    %27 = arith.addf %24, %26 : vector<8x4xf32>
    %28 = arith.subf %7, %19 : vector<8x4xf32>
    %29 = arith.mulf %28, %28 : vector<8x4xf32>
    %30 = arith.addf %27, %29 : vector<8x4xf32>
    %c0_23 = arith.constant 0 : index
    %c0_24 = arith.constant 0 : index
    %c0_25 = arith.constant 0 : index
    %31 = vector.load %arg6[%c0_23, %c0_24, %c0_25] : memref<1x8x4xf32, #tpu.memory_space<vmem>>, vector<1x8x4xf32>
    %32 = vector.shape_cast %31 : vector<1x8x4xf32> to vector<8x4xf32>
    %33 = vector.shape_cast %30 : vector<8x4xf32> to vector<1x8x4xf32>
    tpu.vector_store %arg6[%c0_23, %c0_24, %c0_25], %33 {strides = array<i32>} : memref<1x8x4xf32, #tpu.memory_space<vmem>>, vector<1x8x4xf32>,
    return
  }
  func.func @transform_0(%arg0: i32) -> (i32, i32) {
    %c0_i32 = arith.constant 0 : i32
    %c0_i32_0 = arith.constant 0 : i32
    return %arg0, %c0_i32 : i32, i32
  }
  func.func @transform_1(%arg0: i32) -> (i32, i32) {
    %c0_i32 = arith.constant 0 : i32
    %c0_i32_0 = arith.constant 0 : i32
    return %arg0, %c0_i32 : i32, i32
  }
  func.func @transform_2(%arg0: i32) -> (i32, i32) {
    %c0_i32 = arith.constant 0 : i32
    %c0_i32_0 = arith.constant 0 : i32
    %c0_i32_1 = arith.constant 0 : i32
    return %c0_i32, %c0_i32_0 : i32, i32
  }
  func.func @transform_3(%arg0: i32) -> (i32, i32, i32) {
    %c0_i32 = arith.constant 0 : i32
    %c0_i32_0 = arith.constant 0 : i32
    %c0_i32_1 = arith.constant 0 : i32
    %c0_i32_2 = arith.constant 0 : i32
    return %c0_i32, %c0_i32_0, %c0_i32_1 : i32, i32, i32
  }
  func.func @transform_4(%arg0: i32) -> (i32, i32, i32) {
    %c0_i32 = arith.constant 0 : i32
    %c0_i32_0 = arith.constant 0 : i32
    %c0_i32_1 = arith.constant 0 : i32
    %c0_i32_2 = arith.constant 0 : i32
    return %c0_i32, %c0_i32_0, %c0_i32_1 : i32, i32, i32
  }
  func.func @transform_5(%arg0: i32) -> (i32, i32, i32) {
    %c0_i32 = arith.constant 0 : i32
    %c0_i32_0 = arith.constant 0 : i32
    %c0_i32_1 = arith.constant 0 : i32
    return %arg0, %c0_i32, %c0_i32_0 : i32, i32, i32
  }
}

</mosaic_0001>

<bundles_post_ra>
// kernel: spatial_consistency_loss.1
= control target key start
LH: loop header
LB: loop body
LE: loop exit
PB: predicated region body
PF: predicated region fallthrough
CT: control target
= control target key end

     0   :  { %10 = vsyncpa [#allocation3], 0  ;;  %s439_s0 = inlined_call_operand.vmem [shape: f32[128,16], index: 0, kind: input, shape index: {}]   ;;  %s440_s1 = inlined_call_operand.hbm [shape: f32[128,16], index: 1, kind: input, shape index: {}]   ;;  %s441_s2 = inlined_call_operand.vmem [shape: f32[8,128], index: 2, kind: input, shape index: {}]   ;;  %s442_s3 = inlined_call_operand.vmem [shape: f32[3,16,4], index: 3, kind: input, shape index: {}]   ;;  %s443_s4 = inlined_call_operand.vmem [shape: f32[2,8,8], index: 4, kind: input, shape index: {}]   ;;  %s444_s5 = inlined_call_operand.hbm [shape: f32[1,8,4], index: 5, kind: output, shape index: {}]  }
   0x1   :  { %11 = vsyncpa [#allocation4], 0  ;;  %s18_s20 = sshll.u32 %s440_s1, 4  ;;  %s324_s21 = smov [#allocation2]   ;;  %s19_s20 = int_to_ptr.hbm [resolvable:$true] %s18_s20 }
   0x2   :  { %s20_s22 = sshll.u32 %s324_s21, 4  ;;  %s325_s23 = smov 128   ;;  %s21_s22 = int_to_ptr.vmem [resolvable:$true] %s20_s22 }
   0x3   :  { %s326_s24 = smov 8  }
   0x4   :  { %26 = dma.hbm_to_vmem [thread:$0]  %s19_s20, 2048, %s21_s22, [#allocation3], %s325_s23, %s325_s23, %s326_s24  }
   0x5   :  { %320 = dma.done.wait [#allocation3], 2048  }
   0x6   :  { %321 = vsyncadd [#allocation3], 4294965248  ;;  %v52_v0 = vld [vmem:[%s439_s0 + $0x78] sm:$0xff]  ;;  %v51_v2 = vld [vmem:[%s439_s0 + $0x70] sm:$0xff]  ;;  %vm108_vm0 = vcmask 130048   ;;  %vm179_vm1 = vcmask 64512  }
   0x7   :  { %v68_v1 = vld [vmem:[#allocation2 + $0x78] sm:$0xff]  ;;  %v67_v4 = vld [vmem:[#allocation2 + $0x70] sm:$0xff]  ;;  %v50_v5 = vld [vmem:[%s439_s0 + $0x68] sm:$0xff]  ;;  %s248_s23 = sshll.u32 %s444_s5, 4  ;;  %vm239_vm2 = vcmask 31744   ;;  %s249_s23 = int_to_ptr.hbm [resolvable:$true] %s248_s23 }
   0x8   :  { %v84_v3 = vsub.f32 %v52_v0, %v68_v1  ;;  %v66_v6 = vld [vmem:[#allocation2 + $0x68] sm:$0xff]  ;;  %v83_v7 = vsub.f32 %v51_v2, %v67_v4  ;;  %v49_v8 = vld [vmem:[%s439_s0 + $0x60] sm:$0xff]  ;;  %v48_v11 = vld [vmem:[%s439_s0 + $0x58] sm:$0xff] }
   0x9   :  { %v65_v9 = vld [vmem:[#allocation2 + $0x60] sm:$0xff]  ;;  %v82_v10 = vsub.f32 %v50_v5, %v66_v6  ;;  %v64_v12 = vld [vmem:[#allocation2 + $0x58] sm:$0xff]  ;;  %v47_v14 = vld [vmem:[%s439_s0 + $0x50] sm:$0xff] }
   0xa   :  { %86 = vmatpush.msra.mxu0 %v84_v3  ;;  %v81_v13 = vsub.f32 %v49_v8, %v65_v9  ;;  %v63_v15 = vld [vmem:[#allocation2 + $0x50] sm:$0xff]  ;;  %v80_v16 = vsub.f32 %v48_v11, %v64_v12  ;;  %v46_v17 = vld [vmem:[%s439_s0 + $0x48] sm:$0xff]  ;;  %v45_v20 = vld [vmem:[%s439_s0 + $0x40] sm:$0xff] }
   0xb   :  { %v62_v18 = vld [vmem:[#allocation2 + $0x48] sm:$0xff]  ;;  %v79_v19 = vsub.f32 %v47_v14, %v63_v15  ;;  %v61_v21 = vld [vmem:[#allocation2 + $0x40] sm:$0xff]  ;;  %v260_v24 = vld [vmem:[%s442_s3 + $0x18] sm:$0xff] }
   0xc   :  { %87 = vmatpush.msra.mxu0 %v83_v7  ;;  %v78_v22 = vsub.f32 %v46_v17, %v62_v18  ;;  %v107_v23 = vld [vmem:[%s442_s3 + $0x8] sm:$0xff]  ;;  %v44_v26 = vld [vmem:[%s439_s0 + $0x38] sm:$0xff]  ;;  %149 = vmatpush.msra.mxu2 %v260_v24  ;;  %v77_v28 = vsub.f32 %v45_v20, %v61_v21  ;;  %v43_v29 = vld [vmem:[%s439_s0 + $0x30] sm:$0xff] }
   0xd   :  { %v263_v25 = vld [vmem:[%s442_s3 + $0x28] sm:$0xff]  ;;  %v60_v27 = vld [vmem:[#allocation2 + $0x38] sm:$0xff]  ;;  %126 = vmatpush.msra.mxu1 %v107_v23  ;;  %v59_v30 = vld [vmem:[#allocation2 + $0x30] sm:$0xff] }
   0xe   :  { %88 = vmatpush.msra.mxu0 %v82_v10  ;;  %172 = vmatpush.msra.mxu3 %v263_v25  ;;  %v76_v31 = vsub.f32 %v44_v26, %v60_v27  ;;  %v42_v32 = vld [vmem:[%s439_s0 + $0x28] sm:$0xff]  ;;  %v75_v34 = vsub.f32 %v43_v29, %v59_v30  ;;  %v41_v35 = vld [vmem:[%s439_s0 + $0x20] sm:$0xff]  ;;  %v40_v38 = vld [vmem:[%s439_s0 + $0x18] sm:$0xff] }
   0xf   :  { %v58_v33 = vld [vmem:[#allocation2 + $0x28] sm:$0xff]  ;;  %v57_v36 = vld [vmem:[#allocation2 + $0x20] sm:$0xff]  ;;  %v56_v39 = vld [vmem:[#allocation2 + $0x18] sm:$0xff] }
  0x10   :  { %89 = vmatpush.msra.mxu0 %v81_v13  ;;  %v74_v37 = vsub.f32 %v42_v32, %v58_v33  ;;  %v73_v40 = vsub.f32 %v41_v35, %v57_v36  ;;  %v39_v41 = vld [vmem:[%s439_s0 + $0x10] sm:$0xff]  ;;  %v72_v43 = vsub.f32 %v40_v38, %v56_v39  ;;  %v38_v44 = vld [vmem:[%s439_s0 + $0x8] sm:$0xff]  ;;  %v37_v47 = vld [vmem:[%s439_s0] sm:$0xff] }
  0x11   :  { %v55_v42 = vld [vmem:[#allocation2 + $0x10] sm:$0xff]  ;;  %v54_v45 = vld [vmem:[#allocation2 + $0x8] sm:$0xff]  ;;  %v53_v48 = vld [vmem:[#allocation2] sm:$0xff] }
  0x12   :  { %90 = vmatpush.msra.mxu0 %v80_v16  ;;  %v71_v46 = vsub.f32 %v39_v41, %v55_v42  ;;  %v70_v49 = vsub.f32 %v38_v44, %v54_v45  ;;  %v69_v50 = vsub.f32 %v37_v47, %v53_v48  ;;  %v85_v51 = vld [vmem:[%s441_s2] sm:$0xff]  ;;  %v259_v53 = vld [vmem:[%s442_s3 + $0x10] sm:$0xff]  ;;  %v266_v57 = vld [vmem:[%s443_s4 + $0x8] sm:$0xff] }
  0x13   :  { %v106_v52 = vld [vmem:[%s442_s3] sm:$0xff]  ;;  %150 = vmatpush.msra.mxu2 %v259_v53 }
  0x14   :  { %91 = vmatpush.msra.mxu0 %v79_v19  ;;  %v262_v54 = vld [vmem:[%s442_s3 + $0x20] sm:$0xff]  ;;  %127 = vmatpush.msra.mxu1 %v106_v52  ;;  %s327_s3 = smov [#allocation5]  }
  0x15   :  { %173 = vmatpush.msra.mxu3 %v262_v54  ;;  %v178_v56 = vld [vmem:[%s443_s4] sm:$0xff]  ;;  %s246_s21 = sshll.u32 %s327_s3, 4  ;;  %s247_s21 = int_to_ptr.vmem [resolvable:$true] %s246_s21 }
  0x16   :  { %92 = vmatpush.msra.mxu0 %v78_v22 }
  0x18   :  { %93 = vmatpush.msra.mxu0 %v77_v28 }
  0x1a   :  { %94 = vmatpush.msra.mxu0 %v76_v31 }
  0x1c   :  { %95 = vmatpush.msra.mxu0 %v75_v34 }
  0x1e   :  { %96 = vmatpush.msra.mxu0 %v74_v37 }
  0x20   :  { %97 = vmatpush.msra.mxu0 %v73_v40 }
  0x22   :  { %98 = vmatpush.msra.mxu0 %v72_v43 }
  0x24   :  { %99 = vmatpush.msra.mxu0 %v71_v46 }
  0x26   :  { %100 = vmatpush.msra.mxu0 %v70_v49 }
  0x28   :  { %101 = vmatpush.msra.mxu0 %v69_v50 }
  0x29   :  { %102 = vmatmul.f32.vlgmr.msra.gmra.mxu0 %v85_v51 }
  0xa6   :  { %v103_v55 = vpop.f32.mrf.mxu0 }
  0xa7   :  { %258 = vmatmul.msk.f32.vlgmr.msra.gmra.mxu1 %vm108_vm0, %v103_v55  ;;  %261 = vmatmul.msk.f32.vlgmr.msra.gmra.mxu2 %vm108_vm0, %v103_v55 }
  0xa8   :  { %264 = vmatmul.msk.f32.vlgmr.msra.gmra.mxu3 %vm108_vm0, %v103_v55 }
 0x124   :  { %v129_v58 = vpop.f32.mrf.mxu1 }
 0x125   :  { %198 = vmatpush.msrb.mxu1 %v129_v58  ;;  %223 = vmatpush.msrb.mxu2 %v129_v58 }
 0x126   :  { %265 = vmatmul.msk.f32.vlgmr.msrb.gmra.mxu1 %vm179_vm1, %v178_v56  ;;  %267 = vmatmul.msk.f32.vlgmr.msrb.gmra.mxu2 %vm179_vm1, %v266_v57 }
 0x12a   :  { %v152_v59 = vpop.f32.mrf.mxu2 }
 0x12b   :  { %v175_v60 = vpop.f32.mrf.mxu3  ;;  %v228_v61 = vsub.f32 %v129_v58, %v152_v59 }
 0x12c   :  { %v230_v62 = vsub.f32 %v129_v58, %v175_v60 }
 0x12d   :  { %v229_v1 = vmul.f32 %v228_v61, %v228_v61 }
 0x12e   :  { %v231_v2 = vmul.f32 %v230_v62, %v230_v62 }
 0x130   :  { %v232_v5 = vadd.f32 %v231_v2, %v229_v1 }
 0x1a3   :  { %v200_v63 = vpop.f32.mrf.mxu1 }
 0x1a4   :  { %v233_v0 = vsub.f32 %v129_v58, %v200_v63 }
 0x1a6   :  { %v234_v3 = vmul.f32 %v233_v0, %v233_v0 }
 0x1a8   :  { %v235_v7 = vadd.f32 %v234_v3, %v232_v5 }
 0x1a9   :  { %v225_v4 = vpop.f32.mrf.mxu2 }
 0x1aa   :  { %v236_v6 = vsub.f32 %v129_v58, %v225_v4 }
 0x1ac   :  { %v237_v8 = vmul.f32 %v236_v6, %v236_v6 }
 0x1ae   :  { %v238_v9 = vadd.f32 %v237_v8, %v235_v7 }
 0x1b0   :  { %240 = vst.msk [vmem:[#allocation5] sm:$0xff] %vm239_vm2, %v238_v9 }
 0x1b1   :  { %251 = dma.vmem_to_hbm [thread:$0]  %s247_s21, 128, %s249_s23, [#allocation4]  }
 0x1b2   :  { %322 = dma.done.wait [#allocation4], 128  }
 0x1b3   :  { %323 = vsyncadd [#allocation4], 4294967168 }
 0x1b4   :  { %256 = vsyncpa [#allocation3], 1 }
 0x1b5   :  { %257 = vsyncpa [#allocation4], 1 }

</bundles_post_ra>
